<compile_context>
chip_gen: v5e
topology: v5e:2x2
jax: 0.10.0
libtpu: 0.0.40
codegen_flags: <defaults>
</compile_context>

<pallas_src>
import jax
import jax.numpy as jnp
from jax import lax
from jax.experimental import pallas as pl
from jax.experimental.pallas import tpu as pltpu


# --------------------------------------------------------------------------
# Small helpers
# --------------------------------------------------------------------------
def _round_up(x, m):
    return ((x + m - 1) // m) * m


_VMEM_CAP = None


def _vmem_capacity_bytes():
    """Physical VMEM of the current generation (128 MiB v5e/v6e, 64 MiB v7x)."""
    global _VMEM_CAP
    if _VMEM_CAP is None:
        try:
            _VMEM_CAP = int(pltpu.get_tpu_info().vmem_capacity_bytes)
        except Exception:
            _VMEM_CAP = 64 << 20          # conservative fallback (v7x per-TC)
    return _VMEM_CAP


def _compiler_params(semantics, vmem_estimate_bytes):
    """dimension_semantics + generation-aware vmem_limit_bytes."""
    kwargs = dict(dimension_semantics=semantics)
    need = int(vmem_estimate_bytes) + (4 << 20)      # headroom for the compiler
    if need > (16 << 20):                            # v5e default scoped VMEM
        budget = int(_vmem_capacity_bytes() * 0.85)  # leave ~15% physical headroom
        kwargs["vmem_limit_bytes"] = int(min(max(need, 32 << 20), budget))
    return pltpu.CompilerParams(**kwargs)


def _matmul_row_tile(M, K, N, itemsize, budget_bytes):
    """Largest row tile (multiple of 8, divisor of M) that fits the budget."""
    fixed = 2 * K * N * itemsize + 2 * N * 4         # resident W (double-buffered) + bias
    per_row = 2 * (K * itemsize + N * 4)             # double-buffered in rows + f32 out rows
    avail = max(budget_bytes - fixed, 8 * per_row)
    tm_max = max(8, min(int(avail // per_row), 1024, M))
    for cand in (1024, 512, 256, 128, 64, 32, 16, 8):
        if cand <= tm_max and M % cand == 0:
            return cand
    return 8                                          # M is always a multiple of 8


def _pick_time_block(T, Bp, Hp, itemsize, budget_bytes):
    """Timesteps per grid iteration: amortize grid overhead, stay within VMEM."""
    fixed = 2 * Hp * Hp * itemsize + 2 * Bp * Hp * itemsize + 4 * Bp * Hp
    per_step = 2 * Bp * Hp * 4 + 2 * Bp * Hp * itemsize   # preact(f32) in + hidden out, dbl-buffered
    avail = max(budget_bytes - fixed, per_step)
    return max(1, min(int(avail // per_step), 16, T))


# --------------------------------------------------------------------------
# Kernels
# --------------------------------------------------------------------------
def _matmul_bias_kernel(x_ref, w_ref, b_ref, out_ref):
    """Row-parallel out = x @ W + b (f32 accumulate). Used for both the
    hoisted input projection (Phase 0) and the output projection (Phase 2)."""
    out = (jnp.dot(x_ref[...], w_ref[...], preferred_element_type=jnp.float32)
           + b_ref[...])
    out_ref[...] = out.astype(out_ref.dtype)


def _recurrence_kernel(pre_ref, wh_ref, h0_ref, hid_ref, h_scr):
    """TT timesteps per grid iteration; hidden carried in f32 VMEM scratch.

    pre_ref: (TT, Bp, Hp) f32   precomputed x_t @ Wx + b_i2h (streamed)
    wh_ref:  (Hp, Hp)           resident (constant index_map)
    h0_ref:  (Bp, Hp)           resident, read only at grid step 0
    hid_ref: (TT, Bp, Hp)       per-step hidden outputs (streamed)
    h_scr:   (Bp, Hp) f32       carried hidden state
    """
    @pl.when(pl.program_id(0) == 0)
    def _():
        h_scr[...] = h0_ref[...].astype(jnp.float32)

    tt = pre_ref.shape[0]

    def step(t, carry):
        h_prev = h_scr[...].astype(wh_ref.dtype)
        pre = pre_ref[t] + jnp.dot(h_prev, wh_ref[...],
                                   preferred_element_type=jnp.float32)
        h_new = jnp.maximum(pre, 0.0)     # ReLU in f32 (v5e has no bf16 VPU)
        h_scr[...] = h_new
        hid_ref[t] = h_new.astype(hid_ref.dtype)
        return carry

    lax.fori_loop(0, tt, step, 0, unroll=True)


# --------------------------------------------------------------------------
# Parameters
# --------------------------------------------------------------------------
def init_params(key, input_size, hidden_size, output_size, dtype=jnp.float32):
    """nn.Linear-style init, stored already transposed: (in_feat, out_feat)."""
    k1, k2, k3, k4 = jax.random.split(key, 4)
    fan_i2h = input_size + hidden_size
    bnd1 = 1.0 / (fan_i2h ** 0.5)
    bnd2 = 1.0 / (hidden_size ** 0.5)
    w_i2h_t = jax.random.uniform(k1, (fan_i2h, hidden_size), dtype, -bnd1, bnd1)
    b_i2h = jax.random.uniform(k2, (hidden_size,), dtype, -bnd1, bnd1)
    w_h2o_t = jax.random.uniform(k3, (hidden_size, output_size), dtype, -bnd2, bnd2)
    b_h2o = jax.random.uniform(k4, (output_size,), dtype, -bnd2, bnd2)
    # Split W_i2h^T at the input/hidden boundary (== dropping the runtime cat).
    wx_t = w_i2h_t[:input_size]      # (I, H)
    wh_t = w_i2h_t[input_size:]      # (H, H)
    return wx_t, wh_t, b_i2h, w_h2o_t, b_h2o


def prepare_params(wx_t, wh_t, b_i2h, w_h2o_t, b_h2o, batch_size,
                   compute_dtype=jnp.float32):
    """One-time zero-padding of parameters to TPU tiles (off the hot path).

    compute_dtype=jnp.bfloat16 is recommended on v6e/v7x (halves resident Wh
    VMEM and HBM traffic; MXU is native bf16). Keep f32 on v5e.
    """
    I, H = wx_t.shape
    O = w_h2o_t.shape[1]
    itemsize = jnp.dtype(compute_dtype).itemsize
    Ip = _round_up(I, 128)
    Hp = _round_up(H, 128)
    Op = _round_up(O, 128)
    Bp = _round_up(batch_size, 16 if itemsize < 4 else 8)

    def pad2(a, r, c):
        return jnp.pad(a, ((0, r - a.shape[0]), (0, c - a.shape[1])))

    return dict(
        I=I, H=H, O=O, B=batch_size, Ip=Ip, Hp=Hp, Op=Op, Bp=Bp,
        dtype=compute_dtype,
        wx_t=pad2(wx_t, Ip, Hp).astype(compute_dtype),
        wh_t=pad2(wh_t, Hp, Hp).astype(compute_dtype),
        b_i2h=jnp.pad(b_i2h, (0, Hp - H)).astype(jnp.float32).reshape(1, Hp),
        w_h2o_t=pad2(w_h2o_t, Hp, Op).astype(compute_dtype),
        b_h2o=jnp.pad(b_h2o, (0, Op - O)).astype(jnp.float32).reshape(1, Op),
    )


# --------------------------------------------------------------------------
# Forward
# --------------------------------------------------------------------------
def rnn_naive_sequence(xs, hidden, params):
    """Fused T-step recurrence. xs: (T, B, I); hidden: (1 or B, H).

    Returns (outputs (T, B, O) f32, hiddens (T, B, H) compute_dtype)."""
    T, B, I = xs.shape
    H, O = params["H"], params["O"]
    Ip, Hp, Op, Bp = params["Ip"], params["Hp"], params["Op"], params["Bp"]
    dtype = params["dtype"]
    itemsize = jnp.dtype(dtype).itemsize
    assert B == params["B"] and I == params["I"]

    cap = _vmem_capacity_bytes()
    sizing_budget = int(cap * 0.5)            # tile sizing target; limit set later

    # Time blocking: TT steps per sequential grid iteration.
    TT = _pick_time_block(T, Bp, Hp, itemsize, sizing_budget)
    Tp = _round_up(T, TT)

    # PyTorch: expand a (1, H) initial hidden over the batch.
    if hidden.shape[0] < B:
        hidden = jnp.broadcast_to(hidden, (B, H))

    # Pad activations only when something is actually misaligned.
    if (Tp, Bp, Ip) != (T, B, I):
        xs_p = jnp.pad(xs, ((0, Tp - T), (0, Bp - B), (0, Ip - I)))
    else:
        xs_p = xs
    xs_p = xs_p.astype(dtype)

    if (Bp, Hp) != (B, H):
        h0_p = jnp.pad(hidden, ((0, Bp - B), (0, Hp - H)))
    else:
        h0_p = hidden
    h0_p = h0_p.astype(dtype)

    # ---- Phase 0: hoisted input projection  preact = x @ Wx + b_i2h --------
    # Runs as one big lane-dense batched matmul over all Tp*Bp rows ("parallel"
    # grid -> shards across both TensorCores on v7x). Stored in f32 so the
    # serial phase adds it at full precision.
    M0 = Tp * Bp
    x_flat = xs_p.reshape(M0, Ip)
    TM0 = _matmul_row_tile(M0, Ip, Hp, itemsize, sizing_budget)
    pre_vmem = (2 * TM0 * Ip * itemsize + 2 * Ip * Hp * itemsize
                + 2 * Hp * 4 + 2 * TM0 * Hp * 4)
    preact_flat = pl.pallas_call(
        _matmul_bias_kernel,
        grid=(M0 // TM0,),
        in_specs=[
            pl.BlockSpec((TM0, Ip), lambda i: (i, 0)),
            pl.BlockSpec((Ip, Hp), lambda i: (0, 0)),     # Wx (resident)
            pl.BlockSpec((1, Hp), lambda i: (0, 0)),      # b_i2h
        ],
        out_specs=pl.BlockSpec((TM0, Hp), lambda i: (i, 0)),
        out_shape=jax.ShapeDtypeStruct((M0, Hp), jnp.float32),
        compiler_params=_compiler_params(("parallel",), pre_vmem),
    )(x_flat, params["wx_t"], params["b_i2h"])
    preact = preact_flat.reshape(Tp, Bp, Hp)

    # ---- Phase 1: sequential recurrence  h_t = relu(preact_t + h_{t-1}@Wh) --
    # One launch; Wh resident; hidden carried in f32 scratch; TT steps per
    # grid iteration. VMEM estimate counts the pipeline's 2x buffering of the
    # resident weight/h0 blocks.
    # TODO(synk): for very large Hp (f32 Hp>=2048 on v7x) tile the Hp
    # contraction of h@Wh instead of keeping the full Wh resident.
    # TODO(synk): on v7x with Bp>=16, add a leading batch-shard grid axis
    # (grid=(2, Tp//TT), "parallel") to use both TensorCores for the recurrence.
    rec_vmem = (2 * TT * Bp * Hp * 4            # preact blocks (f32, dbl-buffered)
                + 2 * Hp * Hp * itemsize        # Wh (resident, dbl-buffered)
                + 2 * Bp * Hp * itemsize        # h0 (resident, dbl-buffered)
                + 2 * TT * Bp * Hp * itemsize   # hidden out blocks
                + Bp * Hp * 4)                  # f32 scratch carry
    hiddens_p = pl.pallas_call(
        _recurrence_kernel,
        grid=(Tp // TT,),
        in_specs=[
            pl.BlockSpec((TT, Bp, Hp), lambda t: (t, 0, 0)),  # preact (streamed)
            pl.BlockSpec((Hp, Hp), lambda t: (0, 0)),         # Wh (resident)
            pl.BlockSpec((Bp, Hp), lambda t: (0, 0)),         # h0
        ],
        out_specs=pl.BlockSpec((TT, Bp, Hp), lambda t: (t, 0, 0)),
        out_shape=jax.ShapeDtypeStruct((Tp, Bp, Hp), dtype),
        scratch_shapes=[pltpu.VMEM((Bp, Hp), jnp.float32)],
        compiler_params=_compiler_params(("arbitrary",), rec_vmem),
    )(preact, params["wh_t"], h0_p)

    # ---- Phase 2: output projection  out = h @ Wo + b_h2o -------------------
    # Hoisted out of the recurrence; one batched lane-dense matmul, parallel
    # grid (2 TCs on v7x).
    # TODO(synk): on v5e consider fusing this into Phase 1 (second output) to
    # skip the HBM roundtrip of the hidden states.
    M = Tp * Bp
    h_flat = hiddens_p.reshape(M, Hp)
    TM = _matmul_row_tile(M, Hp, Op, itemsize, sizing_budget)
    proj_vmem = (2 * TM * Hp * itemsize + 2 * Hp * Op * itemsize
                 + 2 * Op * 4 + 2 * TM * Op * 4)
    outs_flat = pl.pallas_call(
        _matmul_bias_kernel,
        grid=(M // TM,),
        in_specs=[
            pl.BlockSpec((TM, Hp), lambda i: (i, 0)),
            pl.BlockSpec((Hp, Op), lambda i: (0, 0)),     # Wo (resident)
            pl.BlockSpec((1, Op), lambda i: (0, 0)),      # b_h2o
        ],
        out_specs=pl.BlockSpec((TM, Op), lambda i: (i, 0)),
        out_shape=jax.ShapeDtypeStruct((M, Op), jnp.float32),
        compiler_params=_compiler_params(("parallel",), proj_vmem),
    )(h_flat, params["w_h2o_t"], params["b_h2o"])

    outputs = outs_flat.reshape(Tp, Bp, Op)[:T, :B, :O]
    hiddens = hiddens_p[:T, :B, :H]
    return outputs, hiddens


def rnn_naive_forward(x, hidden, params):
    """Single-step API identical to RNNNaive.forward -> (output, new_hidden)."""
    outputs, hiddens = rnn_naive_sequence(x[None], hidden, params)
    return outputs[0], hiddens[0]


# --------------------------------------------------------------------------
# Demo / correctness check
# --------------------------------------------------------------------------
if __name__ == "__main__":
    input_size, hidden_size, output_size = 16, 32, 8
    batch, seq_len = 4, 8

    key = jax.random.PRNGKey(0)
    kx, kp = jax.random.split(key)
    xs = jax.random.normal(kx, (seq_len, batch, input_size), jnp.float32)
    hidden0 = jnp.zeros((1, hidden_size), jnp.float32)      # initHidden()

    wx_t, wh_t, b_i2h, w_h2o_t, b_h2o = init_params(
        kp, input_size, hidden_size, output_size)
    # f32 for the exact-tolerance demo; pass compute_dtype=jnp.bfloat16 on
    # v6e/v7x for production (bf16-rounded hiddens -> looser tolerance).
    params = prepare_params(wx_t, wh_t, b_i2h, w_h2o_t, b_h2o, batch)

    # Fused sequence: hoisted x-projection + one recurrence launch + one
    # projection launch for all T.
    outputs, hiddens = rnn_naive_sequence(xs, hidden0, params)
    # Single-step call matching the PyTorch module's forward().
    out1, hid1 = rnn_naive_forward(xs[0], hidden0, params)
    jax.block_until_ready((outputs, hiddens, out1, hid1))

    # Pure-JAX step-by-step reference of the PyTorch semantics.
    h = jnp.broadcast_to(hidden0, (batch, hidden_size))
    ref_outs, ref_hids = [], []
    for t in range(seq_len):
        h = jnp.maximum(xs[t] @ wx_t + h @ wh_t + b_i2h, 0.0)
        ref_outs.append(h @ w_h2o_t + b_h2o)
        ref_hids.append(h)
    ref_outs = jnp.stack(ref_outs)
    ref_hids = jnp.stack(ref_hids)

    assert outputs.shape == (seq_len, batch, output_size)
    assert hiddens.shape == (seq_len, batch, hidden_size)
    assert jnp.allclose(outputs, ref_outs, atol=1e-5)
    assert jnp.allclose(hiddens, ref_hids, atol=1e-5)
    assert jnp.allclose(out1, ref_outs[0], atol=1e-5)
    assert jnp.allclose(hid1, ref_hids[0], atol=1e-5)

    print("KERNEL_OK")
</pallas_src>

<mosaic_0001>
module attributes {stable_mosaic.version = 11 : i64} {
  func.func @_matmul_bias_kernel(%arg0: i32, %arg1: memref<64x128xf32, #tpu.memory_space<vmem>>, %arg2: memref<128x128xf32, #tpu.memory_space<vmem>>, %arg3: memref<1x128xf32, #tpu.memory_space<vmem>>, %arg4: memref<64x128xf32, #tpu.memory_space<vmem>>) attributes {dimension_semantics = [#tpu.dimension_semantics<parallel>], iteration_bounds = array<i64: 1>, scalar_prefetch = 0 : i64, scratch_operands = 0 : i64, tpu.core_type = #tpu.core_type<tc>, window_params = [{transform_indices = @transform_0, window_bounds = array<i64: 64, 128>}, {pipeline_mode = #tpu.pipeline_mode<synchronous>, transform_indices = @transform_1, window_bounds = array<i64: 128, 128>}, {pipeline_mode = #tpu.pipeline_mode<synchronous>, transform_indices = @transform_2, window_bounds = array<i64: 1, 128>}, {transform_indices = @transform_3, window_bounds = array<i64: 64, 128>}]} {
    %c0 = arith.constant 0 : index
    %c0_0 = arith.constant 0 : index
    %0 = vector.load %arg1[%c0, %c0_0] : memref<64x128xf32, #tpu.memory_space<vmem>>, vector<64x128xf32>
    %c0_1 = arith.constant 0 : index
    %c0_2 = arith.constant 0 : index
    %1 = vector.load %arg2[%c0_1, %c0_2] : memref<128x128xf32, #tpu.memory_space<vmem>>, vector<128x128xf32>
    %cst = arith.constant dense<0.000000e+00> : vector<64x128xf32>
    %2 = tpu.matmul %0, %1, %cst {dimension_numbers = #tpu.dot_dimension_numbers<[1], [0], [0], [1], [0, 0, 1, 1], [], []>} : vector<64x128xf32>, vector<128x128xf32>, vector<64x128xf32> -> vector<64x128xf32>
    %c0_3 = arith.constant 0 : index
    %c0_4 = arith.constant 0 : index
    %3 = vector.load %arg3[%c0_3, %c0_4] : memref<1x128xf32, #tpu.memory_space<vmem>>, vector<1x128xf32>
    %4 = vector.broadcast %3 : vector<1x128xf32> to vector<64x128xf32>
    %5 = arith.addf %2, %4 : vector<64x128xf32>
    %c0_5 = arith.constant 0 : index
    %c0_6 = arith.constant 0 : index
    %6 = vector.load %arg4[%c0_5, %c0_6] : memref<64x128xf32, #tpu.memory_space<vmem>>, vector<64x128xf32>
    tpu.vector_store %arg4[%c0_5, %c0_6], %5 {strides = array<i32>} : memref<64x128xf32, #tpu.memory_space<vmem>>, vector<64x128xf32>,
    return
  }
  func.func @transform_0(%arg0: i32) -> (i32, i32) {
    %c0_i32 = arith.constant 0 : i32
    %c0_i32_0 = arith.constant 0 : i32
    return %arg0, %c0_i32 : i32, i32
  }
  func.func @transform_1(%arg0: i32) -> (i32, i32) {
    %c0_i32 = arith.constant 0 : i32
    %c0_i32_0 = arith.constant 0 : i32
    %c0_i32_1 = arith.constant 0 : i32
    return %c0_i32, %c0_i32_0 : i32, i32
  }
  func.func @transform_2(%arg0: i32) -> (i32, i32) {
    %c0_i32 = arith.constant 0 : i32
    %c0_i32_0 = arith.constant 0 : i32
    %c0_i32_1 = arith.constant 0 : i32
    return %c0_i32, %c0_i32_0 : i32, i32
  }
  func.func @transform_3(%arg0: i32) -> (i32, i32) {
    %c0_i32 = arith.constant 0 : i32
    %c0_i32_0 = arith.constant 0 : i32
    return %arg0, %c0_i32 : i32, i32
  }
}

</mosaic_0001>

<bundles_post_ra>
// kernel: tpu_custom_call.1
= control target key start
LH: loop header
LB: loop body
LE: loop exit
PB: predicated region body
PF: predicated region fallthrough
CT: control target
= control target key end

     0   :  { %8 = vsyncpa [#allocation3], 0  ;;  %s322_s0 = inlined_call_operand.hbm [shape: f32[64,128], index: 0, kind: input, shape index: {}]   ;;  %s323_s1 = inlined_call_operand.hbm [shape: f32[128,128], index: 1, kind: input, shape index: {}]   ;;  %s324_s2 = inlined_call_operand.vmem [shape: f32[1,128], index: 2, kind: input, shape index: {}]   ;;  %s325_s3 = inlined_call_operand.hbm [shape: f32[64,128], index: 3, kind: output, shape index: {}]  }
   0x1   :  { %9 = vsyncpa [#allocation6], 0 }
   0x2   :  { %10 = vsyncpa [#allocation4], 0  ;;  %s15_s14 = sshll.u32 %s322_s0, 4  ;;  %s276_s15 = smov [#allocation2]   ;;  %s16_s14 = int_to_ptr.hbm [resolvable:$true] %s15_s14 }
   0x3   :  { %s17_s16 = sshll.u32 %s276_s15, 4  ;;  %s28_s19 = sshll.u32 %s323_s1, 4  ;;  %s18_s16 = int_to_ptr.vmem [resolvable:$true] %s17_s16  ;;  %s29_s19 = int_to_ptr.hbm [resolvable:$true] %s28_s19 }
   0x4   :  { %s277_s20 = smov 128   ;;  %s278_s21 = smov 8  }
   0x5   :  { %23 = dma.hbm_to_vmem [thread:$0]  %s16_s14, 1024, %s18_s16, [#allocation3], %s277_s20, %s277_s20, %s278_s21  }
   0x6   :  { %s279_s22 = smov [#allocation5]  }
   0x7   :  { %s30_s23 = sshll.u32 %s279_s22, 4  ;;  %s31_s23 = int_to_ptr.vmem [resolvable:$true] %s30_s23 }
   0x8   :  { %36 = dma.hbm_to_vmem [thread:$0]  %s29_s19, 2048, %s31_s23, [#allocation6], %s277_s20, %s277_s20, %s278_s21  }
   0x9   :  { %270 = dma.done.wait [#allocation3], 1024  }
   0xa   :  { %271 = vsyncadd [#allocation3], 4294966272 }
   0xb   :  { %272 = dma.done.wait [#allocation6], 2048  }
   0xc   :  { %273 = vsyncadd [#allocation6], 4294965248  ;;  %v70_v0 = vld [vmem:[#allocation5 + $0x78] sm:$0xff]  ;;  %v69_v1 = vld [vmem:[#allocation5 + $0x70] sm:$0xff]  ;;  %s280_s24 = smov [#allocation7]   ;;  %s130_s27 = sshll.u32 %s325_s3, 4  ;;  %s131_s27 = int_to_ptr.hbm [resolvable:$true] %s130_s27 }
   0xd   :  { %145 = vmatpush.msra.mxu2 %v70_v0  ;;  %146 = vmatpush.msra.mxu3 %v70_v0  ;;  %v68_v2 = vld [vmem:[#allocation5 + $0x68] sm:$0xff]  ;;  %v67_v3 = vld [vmem:[#allocation5 + $0x60] sm:$0xff]  ;;  %v66_v4 = vld [vmem:[#allocation5 + $0x58] sm:$0xff]  ;;  %s128_s25 = sshll.u32 %s280_s24, 4  ;;  %s129_s25 = int_to_ptr.vmem [resolvable:$true] %s128_s25 }
   0xe   :  { %75 = vmatpush.msra.mxu0 %v70_v0  ;;  %144 = vmatpush.msra.mxu1 %v70_v0  ;;  %v65_v5 = vld [vmem:[#allocation5 + $0x50] sm:$0xff]  ;;  %v64_v6 = vld [vmem:[#allocation5 + $0x48] sm:$0xff]  ;;  %v63_v7 = vld [vmem:[#allocation5 + $0x40] sm:$0xff] }
   0xf   :  { %148 = vmatpush.msra.mxu2 %v69_v1  ;;  %149 = vmatpush.msra.mxu3 %v69_v1  ;;  %v62_v8 = vld [vmem:[#allocation5 + $0x38] sm:$0xff]  ;;  %v61_v9 = vld [vmem:[#allocation5 + $0x30] sm:$0xff]  ;;  %v60_v10 = vld [vmem:[#allocation5 + $0x28] sm:$0xff] }
  0x10   :  { %76 = vmatpush.msra.mxu0 %v69_v1  ;;  %147 = vmatpush.msra.mxu1 %v69_v1  ;;  %v59_v11 = vld [vmem:[#allocation5 + $0x20] sm:$0xff]  ;;  %v58_v12 = vld [vmem:[#allocation5 + $0x18] sm:$0xff]  ;;  %v57_v13 = vld [vmem:[#allocation5 + $0x10] sm:$0xff] }
  0x11   :  { %151 = vmatpush.msra.mxu2 %v68_v2  ;;  %152 = vmatpush.msra.mxu3 %v68_v2  ;;  %v56_v14 = vld [vmem:[#allocation5 + $0x8] sm:$0xff]  ;;  %v55_v15 = vld [vmem:[#allocation5] sm:$0xff]  ;;  %v53_v17 = vld [vmem:[#allocation2 + $0x30] sm:$0xff] }
  0x12   :  { %77 = vmatpush.msra.mxu0 %v68_v2  ;;  %150 = vmatpush.msra.mxu1 %v68_v2  ;;  %v51_v16 = vld [vmem:[#allocation2 + $0x20] sm:$0xff]  ;;  %v49_v19 = vld [vmem:[#allocation2 + $0x10] sm:$0xff]  ;;  %v52_v20 = vld [vmem:[#allocation2 + $0x28] sm:$0xff] }
  0x13   :  { %154 = vmatpush.msra.mxu2 %v67_v3  ;;  %155 = vmatpush.msra.mxu3 %v67_v3  ;;  %v47_v18 = vld [vmem:[#allocation2] sm:$0xff]  ;;  %v54_v21 = vld [vmem:[#allocation2 + $0x38] sm:$0xff]  ;;  %v48_v22 = vld [vmem:[#allocation2 + $0x8] sm:$0xff] }
  0x14   :  { %78 = vmatpush.msra.mxu0 %v67_v3  ;;  %153 = vmatpush.msra.mxu1 %v67_v3  ;;  %v50_v23 = vld [vmem:[#allocation2 + $0x18] sm:$0xff]  ;;  %v197_v24 = vld [vmem:[%s324_s2] ss:$0 sm:$0xff] }
  0x15   :  { %157 = vmatpush.msra.mxu2 %v66_v4  ;;  %158 = vmatpush.msra.mxu3 %v66_v4 }
  0x16   :  { %79 = vmatpush.msra.mxu0 %v66_v4  ;;  %156 = vmatpush.msra.mxu1 %v66_v4 }
  0x17   :  { %160 = vmatpush.msra.mxu2 %v65_v5  ;;  %161 = vmatpush.msra.mxu3 %v65_v5 }
  0x18   :  { %80 = vmatpush.msra.mxu0 %v65_v5  ;;  %159 = vmatpush.msra.mxu1 %v65_v5 }
  0x19   :  { %163 = vmatpush.msra.mxu2 %v64_v6  ;;  %164 = vmatpush.msra.mxu3 %v64_v6 }
  0x1a   :  { %81 = vmatpush.msra.mxu0 %v64_v6  ;;  %162 = vmatpush.msra.mxu1 %v64_v6 }
  0x1b   :  { %166 = vmatpush.msra.mxu2 %v63_v7  ;;  %167 = vmatpush.msra.mxu3 %v63_v7 }
  0x1c   :  { %82 = vmatpush.msra.mxu0 %v63_v7  ;;  %165 = vmatpush.msra.mxu1 %v63_v7 }
  0x1d   :  { %169 = vmatpush.msra.mxu2 %v62_v8  ;;  %170 = vmatpush.msra.mxu3 %v62_v8 }
  0x1e   :  { %83 = vmatpush.msra.mxu0 %v62_v8  ;;  %168 = vmatpush.msra.mxu1 %v62_v8 }
  0x1f   :  { %172 = vmatpush.msra.mxu2 %v61_v9  ;;  %173 = vmatpush.msra.mxu3 %v61_v9 }
  0x20   :  { %84 = vmatpush.msra.mxu0 %v61_v9  ;;  %171 = vmatpush.msra.mxu1 %v61_v9 }
  0x21   :  { %175 = vmatpush.msra.mxu2 %v60_v10  ;;  %176 = vmatpush.msra.mxu3 %v60_v10 }
  0x22   :  { %85 = vmatpush.msra.mxu0 %v60_v10  ;;  %174 = vmatpush.msra.mxu1 %v60_v10 }
  0x23   :  { %178 = vmatpush.msra.mxu2 %v59_v11  ;;  %179 = vmatpush.msra.mxu3 %v59_v11 }
  0x24   :  { %86 = vmatpush.msra.mxu0 %v59_v11  ;;  %177 = vmatpush.msra.mxu1 %v59_v11 }
  0x25   :  { %181 = vmatpush.msra.mxu2 %v58_v12  ;;  %182 = vmatpush.msra.mxu3 %v58_v12 }
  0x26   :  { %87 = vmatpush.msra.mxu0 %v58_v12  ;;  %180 = vmatpush.msra.mxu1 %v58_v12 }
  0x27   :  { %184 = vmatpush.msra.mxu2 %v57_v13  ;;  %185 = vmatpush.msra.mxu3 %v57_v13 }
  0x28   :  { %88 = vmatpush.msra.mxu0 %v57_v13  ;;  %183 = vmatpush.msra.mxu1 %v57_v13 }
  0x29   :  { %187 = vmatpush.msra.mxu2 %v56_v14  ;;  %188 = vmatpush.msra.mxu3 %v56_v14 }
  0x2a   :  { %89 = vmatpush.msra.mxu0 %v56_v14  ;;  %186 = vmatpush.msra.mxu1 %v56_v14 }
  0x2b   :  { %190 = vmatpush.msra.mxu2 %v55_v15  ;;  %191 = vmatpush.msra.mxu3 %v55_v15 }
  0x2c   :  { %103 = vmatmul.f32.vlgmr.msra.gmra.mxu2 %v51_v16  ;;  %109 = vmatmul.f32.vlgmr.msra.gmra.mxu3 %v53_v17 }
  0x2d   :  { %90 = vmatpush.msra.mxu0 %v55_v15  ;;  %189 = vmatpush.msra.mxu1 %v55_v15 }
  0x2e   :  { %91 = vmatmul.f32.vlgmr.msra.gmra.mxu0 %v47_v18  ;;  %97 = vmatmul.f32.vlgmr.msra.gmra.mxu1 %v49_v19 }
  0x34   :  { %106 = vmatmul.f32.gmra.mxu2 %v52_v20  ;;  %112 = vmatmul.f32.gmra.mxu3 %v54_v21 }
  0x36   :  { %94 = vmatmul.f32.gmra.mxu0 %v48_v22  ;;  %100 = vmatmul.f32.gmra.mxu1 %v50_v23 }
  0xab   :  { %v92_v25 = vpop.f32.mrf.mxu0  ;;  %v98_v26 = vpop.f32.mrf.mxu1 }
  0xac   :  { %v93_v27 = vadd.f32 %v197_v24, %v92_v25  ;;  %v99_v28 = vadd.f32 %v197_v24, %v98_v26 }
  0xae   :  { %116 = vst [vmem:[#allocation7] sm:$0xff] %v93_v27 }
  0xaf   :  { %118 = vst [vmem:[#allocation7 + $0x10] sm:$0xff] %v99_v28  ;;  %v104_v29 = vpop.f32.mrf.mxu2  ;;  %v110_v30 = vpop.f32.mrf.mxu3 }
  0xb0   :  { %v105_v31 = vadd.f32 %v197_v24, %v104_v29  ;;  %v111_v32 = vadd.f32 %v197_v24, %v110_v30 }
  0xb2   :  { %120 = vst [vmem:[#allocation7 + $0x20] sm:$0xff] %v105_v31 }
  0xb3   :  { %122 = vst [vmem:[#allocation7 + $0x30] sm:$0xff] %v111_v32  ;;  %v95_v33 = vpop.f32.mrf.mxu0  ;;  %v101_v34 = vpop.f32.mrf.mxu1 }
  0xb4   :  { %v96_v35 = vadd.f32 %v197_v24, %v95_v33  ;;  %v102_v36 = vadd.f32 %v197_v24, %v101_v34 }
  0xb6   :  { %117 = vst [vmem:[#allocation7 + $0x8] sm:$0xff] %v96_v35 }
  0xb7   :  { %119 = vst [vmem:[#allocation7 + $0x18] sm:$0xff] %v102_v36  ;;  %v107_v37 = vpop.f32.mrf.mxu2  ;;  %v113_v38 = vpop.f32.mrf.mxu3 }
  0xb8   :  { %v108_v39 = vadd.f32 %v197_v24, %v107_v37  ;;  %v114_v40 = vadd.f32 %v197_v24, %v113_v38 }
  0xba   :  { %121 = vst [vmem:[#allocation7 + $0x28] sm:$0xff] %v108_v39 }
  0xbb   :  { %123 = vst [vmem:[#allocation7 + $0x38] sm:$0xff] %v114_v40 }
  0xbc   :  { %136 = dma.vmem_to_hbm [thread:$0]  %s129_s25, 1024, %s131_s27, [#allocation4], %s277_s20, %s277_s20, %s278_s21  }
  0xbd   :  { %274 = dma.done.wait [#allocation4], 1024  }
  0xbe   :  { %275 = vsyncadd [#allocation4], 4294966272 }
  0xbf   :  { %141 = vsyncpa [#allocation3], 1 }
  0xc0   :  { %142 = vsyncpa [#allocation6], 1 }
  0xc1   :  { %143 = vsyncpa [#allocation4], 1 }

</bundles_post_ra>
